<compile_context>
chip_gen: v6e
topology: v6e:2x2x1
jax: 0.10.0
libtpu: 0.0.40
codegen_flags: <defaults>
</compile_context>

<pallas_src>
import functools

import jax
import jax.numpy as jnp
from jax import lax
from jax.experimental import pallas as pl
from jax.experimental.pallas import tpu as pltpu


def _fused_kernel(x_ref, scal_ref, out_ref, xp_ref, *, hin, win):
    # x_ref:    (1, 1, hin, win)  f32 VMEM  -- raw, un-padded input
    # scal_ref: (9,)              f32 SMEM  -- [w_eff(3), c_in(3), c_border(3)]
    # out_ref:  (1, 3, hout, wout) f32 VMEM -- final module output (no post-slice)
    # xp_ref:   (hout, wout)      f32 VMEM scratch -- x with fused +2 zero frame
    hout, wout = hin + 4, win + 4

    # Hoist every SMEM scalar read once, before the vector work.
    w0, w1, w2 = scal_ref[0], scal_ref[1], scal_ref[2]
    ci0, ci1, ci2 = scal_ref[3], scal_ref[4], scal_ref[5]
    cb0, cb1, cb2 = scal_ref[6], scal_ref[7], scal_ref[8]

    # Build the padded input entirely in VMEM (replaces the old wrapper jnp.pad).
    xp_ref[...] = jnp.zeros_like(xp_ref)
    xp_ref[2:2 + hin, 2:2 + win] = x_ref[0, 0]
    xp = xp_ref[...]

    # conv2's zero-padding ring is rows/cols {0, hout-1}/{0, wout-1}; inside it the
    # affine holds (conv1's ring is reproduced by xp's zero frame -> c_in there).
    row = lax.broadcasted_iota(jnp.int32, (hout, wout), 0)
    col = lax.broadcasted_iota(jnp.int32, (hout, wout), 1)
    inner = (row >= 1) & (row <= hout - 2) & (col >= 1) & (col <= wout - 2)

    out_ref[0, 0] = jnp.where(inner, xp * w0 + ci0, cb0)
    out_ref[0, 1] = jnp.where(inner, xp * w1 + ci1, cb1)
    out_ref[0, 2] = jnp.where(inner, xp * w2 + ci2, cb2)


@jax.jit
def model_forward(x1, w1, b1, w2, b2, other=1.0):
    """x1: (1, 1, Hin, Win) f32 NCHW. Returns (1, 3, Hin+4, Win+4) like the PyTorch module."""
    n, cin, hin, win = x1.shape
    assert n == 1 and cin == 1
    hout, wout = hin + 4, win + 4                     # two padding=1 convs

    # Fold conv1 -> conv2 -> (+other) into 9 scalars (tiny; fused into this jit).
    w_eff = (w2 @ w1).reshape(3)                      # (3,)
    c_in = w2 @ b1 + b2 + other                       # (3,)
    c_border = b2 + other                             # (3,)
    scal = jnp.concatenate([w_eff, c_in, c_border]).astype(jnp.float32)

    kernel = functools.partial(_fused_kernel, hin=hin, win=win)
    bytes_accessed = 4 * (hin * win + 9 + 3 * hout * wout)
    out = pl.pallas_call(
        kernel,
        out_shape=jax.ShapeDtypeStruct((1, 3, hout, wout), jnp.float32),
        in_specs=[
            pl.BlockSpec(memory_space=pltpu.MemorySpace.VMEM),
            pl.BlockSpec(memory_space=pltpu.MemorySpace.SMEM),
        ],
        out_specs=pl.BlockSpec(memory_space=pltpu.MemorySpace.VMEM),
        scratch_shapes=[pltpu.VMEM((hout, wout), jnp.float32)],
        cost_estimate=pl.CostEstimate(
            flops=2 * 3 * hout * wout, transcendentals=0, bytes_accessed=bytes_accessed),
    )(x1, scal)
    return out                                        # (1, 3, hout, wout) -- no slice needed


def reference_forward(x1, w1, b1, w2, b2, other=1.0):
    xp1 = jnp.pad(x1[0], ((0, 0), (1, 1), (1, 1)))              # (1, 66, 66)
    var1 = jnp.einsum('oi,ihw->ohw', w1, xp1) + b1[:, None, None]
    v1p = jnp.pad(var1, ((0, 0), (1, 1), (1, 1)))               # (3, 68, 68)
    var2 = jnp.einsum('oi,ihw->ohw', w2, v1p) + b2[:, None, None]
    return (var2 + other)[None]


if __name__ == "__main__":
    key = jax.random.PRNGKey(0)
    kx, k1, k2, k3, k4 = jax.random.split(key, 5)

    # Input consistent with the module: (1, 1, 64, 64)
    x1 = jax.random.normal(kx, (1, 1, 64, 64), dtype=jnp.float32)

    # Deterministic params (Conv2d(1,3,1) and Conv2d(3,3,1) weights squeezed).
    w1 = jax.random.normal(k1, (3, 1), dtype=jnp.float32) * 0.5   # conv1.weight
    b1 = jax.random.normal(k2, (3,), dtype=jnp.float32) * 0.1     # conv1.bias
    w2 = jax.random.normal(k3, (3, 3), dtype=jnp.float32) * 0.5   # conv2.weight
    b2 = jax.random.normal(k4, (3,), dtype=jnp.float32) * 0.1     # conv2.bias

    out = model_forward(x1, w1, b1, w2, b2, 1.0)
    out = jax.block_until_ready(out)

    ref = reference_forward(x1, w1, b1, w2, b2, 1.0)
    assert out.shape == (1, 3, 68, 68), out.shape
    assert jnp.allclose(out, ref, atol=1e-5, rtol=1e-5), float(jnp.max(jnp.abs(out - ref)))

    print("KERNEL_OK")
</pallas_src>

<mosaic_0001>
module attributes {stable_mosaic.version = 11 : i64} {
  func.func @_fused_kernel(%arg0: memref<1x1x64x64xf32, #tpu.memory_space<vmem>>, %arg1: memref<9xf32, #tpu.memory_space<smem>>, %arg2: memref<1x3x68x68xf32, #tpu.memory_space<vmem>>, %arg3: memref<68x68xf32, #tpu.memory_space<vmem>>) attributes {dimension_semantics = [], scalar_prefetch = 0 : i64, scratch_operands = 1 : i64, tpu.core_type = #tpu.core_type<tc>} {
    %c0 = arith.constant 0 : index
    %0 = memref.load %arg1[%c0] : memref<9xf32, #tpu.memory_space<smem>>
    %c1 = arith.constant 1 : index
    %1 = memref.load %arg1[%c1] : memref<9xf32, #tpu.memory_space<smem>>
    %c2 = arith.constant 2 : index
    %2 = memref.load %arg1[%c2] : memref<9xf32, #tpu.memory_space<smem>>
    %c3 = arith.constant 3 : index
    %3 = memref.load %arg1[%c3] : memref<9xf32, #tpu.memory_space<smem>>
    %c4 = arith.constant 4 : index
    %4 = memref.load %arg1[%c4] : memref<9xf32, #tpu.memory_space<smem>>
    %c5 = arith.constant 5 : index
    %5 = memref.load %arg1[%c5] : memref<9xf32, #tpu.memory_space<smem>>
    %c6 = arith.constant 6 : index
    %6 = memref.load %arg1[%c6] : memref<9xf32, #tpu.memory_space<smem>>
    %c7 = arith.constant 7 : index
    %7 = memref.load %arg1[%c7] : memref<9xf32, #tpu.memory_space<smem>>
    %c8 = arith.constant 8 : index
    %8 = memref.load %arg1[%c8] : memref<9xf32, #tpu.memory_space<smem>>
    %cst = arith.constant 0.000000e+00 : f32
    %9 = vector.broadcast %cst : f32 to vector<68x68xf32>
    %c0_0 = arith.constant 0 : index
    %c0_1 = arith.constant 0 : index
    %10 = vector.load %arg3[%c0_0, %c0_1] : memref<68x68xf32, #tpu.memory_space<vmem>>, vector<68x68xf32>
    tpu.vector_store %arg3[%c0_0, %c0_1], %9 {strides = array<i32>} : memref<68x68xf32, #tpu.memory_space<vmem>>, vector<68x68xf32>,
    %c0_2 = arith.constant 0 : index
    %c0_3 = arith.constant 0 : index
    %c0_4 = arith.constant 0 : index
    %c0_5 = arith.constant 0 : index
    %11 = vector.load %arg0[%c0_2, %c0_3, %c0_4, %c0_5] : memref<1x1x64x64xf32, #tpu.memory_space<vmem>>, vector<1x1x64x64xf32>
    %12 = vector.shape_cast %11 : vector<1x1x64x64xf32> to vector<64x64xf32>
    %c2_6 = arith.constant 2 : index
    %c2_7 = arith.constant 2 : index
    %13 = vector.load %arg3[%c2_6, %c2_7] : memref<68x68xf32, #tpu.memory_space<vmem>>, vector<64x64xf32>
    tpu.vector_store %arg3[%c2_6, %c2_7], %12 {strides = array<i32>} : memref<68x68xf32, #tpu.memory_space<vmem>>, vector<64x64xf32>,
    %c0_8 = arith.constant 0 : index
    %c0_9 = arith.constant 0 : index
    %14 = vector.load %arg3[%c0_8, %c0_9] : memref<68x68xf32, #tpu.memory_space<vmem>>, vector<68x68xf32>
    %15 = tpu.iota {dimensions = array<i32: 0>} : vector<68x68xi32>
    %16 = tpu.iota {dimensions = array<i32: 1>} : vector<68x68xi32>
    %c1_i32 = arith.constant 1 : i32
    %17 = vector.broadcast %c1_i32 : i32 to vector<68x68xi32>
    %18 = arith.cmpi sge, %15, %17 : vector<68x68xi32>
    %c66_i32 = arith.constant 66 : i32
    %19 = vector.broadcast %c66_i32 : i32 to vector<68x68xi32>
    %20 = arith.cmpi sle, %15, %19 : vector<68x68xi32>
    %21 = arith.andi %18, %20 : vector<68x68xi1>
    %c1_i32_10 = arith.constant 1 : i32
    %22 = vector.broadcast %c1_i32_10 : i32 to vector<68x68xi32>
    %23 = arith.cmpi sge, %16, %22 : vector<68x68xi32>
    %24 = arith.andi %21, %23 : vector<68x68xi1>
    %c66_i32_11 = arith.constant 66 : i32
    %25 = vector.broadcast %c66_i32_11 : i32 to vector<68x68xi32>
    %26 = arith.cmpi sle, %16, %25 : vector<68x68xi32>
    %27 = arith.andi %24, %26 : vector<68x68xi1>
    %28 = vector.broadcast %0 : f32 to vector<68x68xf32>
    %29 = arith.mulf %14, %28 : vector<68x68xf32>
    %30 = vector.broadcast %3 : f32 to vector<68x68xf32>
    %31 = arith.addf %29, %30 : vector<68x68xf32>
    %32 = vector.broadcast %6 : f32 to vector<68x68xf32>
    %33 = arith.select %27, %31, %32 : vector<68x68xi1>, vector<68x68xf32>
    %c0_12 = arith.constant 0 : index
    %c0_13 = arith.constant 0 : index
    %c0_14 = arith.constant 0 : index
    %c0_15 = arith.constant 0 : index
    %34 = vector.load %arg2[%c0_12, %c0_13, %c0_14, %c0_15] : memref<1x3x68x68xf32, #tpu.memory_space<vmem>>, vector<1x1x68x68xf32>
    %35 = vector.shape_cast %34 : vector<1x1x68x68xf32> to vector<68x68xf32>
    %36 = vector.shape_cast %33 : vector<68x68xf32> to vector<1x1x68x68xf32>
    tpu.vector_store %arg2[%c0_12, %c0_13, %c0_14, %c0_15], %36 {strides = array<i32>} : memref<1x3x68x68xf32, #tpu.memory_space<vmem>>, vector<1x1x68x68xf32>,
    %37 = vector.broadcast %1 : f32 to vector<68x68xf32>
    %38 = arith.mulf %14, %37 : vector<68x68xf32>
    %39 = vector.broadcast %4 : f32 to vector<68x68xf32>
    %40 = arith.addf %38, %39 : vector<68x68xf32>
    %41 = vector.broadcast %7 : f32 to vector<68x68xf32>
    %42 = arith.select %27, %40, %41 : vector<68x68xi1>, vector<68x68xf32>
    %c0_16 = arith.constant 0 : index
    %c1_17 = arith.constant 1 : index
    %c0_18 = arith.constant 0 : index
    %c0_19 = arith.constant 0 : index
    %43 = vector.load %arg2[%c0_16, %c1_17, %c0_18, %c0_19] : memref<1x3x68x68xf32, #tpu.memory_space<vmem>>, vector<1x1x68x68xf32>
    %44 = vector.shape_cast %43 : vector<1x1x68x68xf32> to vector<68x68xf32>
    %45 = vector.shape_cast %42 : vector<68x68xf32> to vector<1x1x68x68xf32>
    tpu.vector_store %arg2[%c0_16, %c1_17, %c0_18, %c0_19], %45 {strides = array<i32>} : memref<1x3x68x68xf32, #tpu.memory_space<vmem>>, vector<1x1x68x68xf32>,
    %46 = vector.broadcast %2 : f32 to vector<68x68xf32>
    %47 = arith.mulf %14, %46 : vector<68x68xf32>
    %48 = vector.broadcast %5 : f32 to vector<68x68xf32>
    %49 = arith.addf %47, %48 : vector<68x68xf32>
    %50 = vector.broadcast %8 : f32 to vector<68x68xf32>
    %51 = arith.select %27, %49, %50 : vector<68x68xi1>, vector<68x68xf32>
    %c0_20 = arith.constant 0 : index
    %c2_21 = arith.constant 2 : index
    %c0_22 = arith.constant 0 : index
    %c0_23 = arith.constant 0 : index
    %52 = vector.load %arg2[%c0_20, %c2_21, %c0_22, %c0_23] : memref<1x3x68x68xf32, #tpu.memory_space<vmem>>, vector<1x1x68x68xf32>
    %53 = vector.shape_cast %52 : vector<1x1x68x68xf32> to vector<68x68xf32>
    %54 = vector.shape_cast %51 : vector<68x68xf32> to vector<1x1x68x68xf32>
    tpu.vector_store %arg2[%c0_20, %c2_21, %c0_22, %c0_23], %54 {strides = array<i32>} : memref<1x3x68x68xf32, #tpu.memory_space<vmem>>, vector<1x1x68x68xf32>,
    return
  }
}

</mosaic_0001>

<bundles_post_ra>
// kernel: model_forward.1
= control target key start
LH: loop header
LB: loop body
LE: loop exit
PB: predicated region body
PF: predicated region fallthrough
CT: control target
= control target key end

     0   :  { %7 = vsyncpa [#allocation4], 0  ;;  %s721_s0 = inlined_call_operand.hbm [shape: f32[1,1,64,64], index: 0, kind: input, shape index: {}]   ;;  %s722_s1 = inlined_call_operand.vmem [shape: f32[9], index: 1, kind: input, shape index: {}]   ;;  %s723_s2 = inlined_call_operand.vmem [shape: f32[1,3,68,68], index: 2, kind: output, shape index: {}]  }
   0x1   :  { %8 = vsyncpa [#allocation5], 0  ;;  %s368_s9 = smov [#allocation3]   ;;  %s27_s13 = sshll.u32 %s722_s1, 4  ;;  %s28_s13 = int_to_ptr.vmem [resolvable:$true] %s27_s13 }
   0x2   :  { %s14_s10 = sshll.u32 %s368_s9, 4  ;;  %s15_s10 = int_to_ptr.vmem [resolvable:$true] %s14_s10 }
   0x3   :  { %s340_s14 = scalar_lea.vmem %s15_s10, 1024  ;;  %p345_p1 = scmp.lt.s32.totalorder %s15_s10, %s15_s10 }
   0x4   :  { %p341_p0 = scmp.ne.s32.totalorder %s15_s10, %s340_s14  ;;  %p346_p2 = scmp.lt.s32.totalorder %s340_s14, %s340_s14 }
   0x6   :  { %p347_p3 = por %p346_p2, %p345_p1 }
   0x8   :  { %p348_p4 = pnand %p347_p3, %p341_p0 }
   0xa   :  { %351 = shalt.err (!%p348_p4)
}
   0xb   :  { %s369_s15 = smov 128   ;;  %s370_s16 = smov 8  }
   0xc   :  { %20 = dma.hbm_to_vmem [thread:$0]  %s721_s0, 1024, %s15_s10, [#allocation4], %s369_s15, %s369_s15, %s370_s16  }
   0xd   :  { %s352_s19 = scalar_lea.vmem %s28_s13, 16  ;;  %p357_p6 = scmp.lt.s32.totalorder %s28_s13, %s28_s13 }
   0xe   :  { %p353_p5 = scmp.ne.s32.totalorder %s28_s13, %s352_s19  ;;  %p358_p7 = scmp.lt.s32.totalorder %s352_s19, %s352_s19 }
  0x10   :  { %p359_p8 = por %p358_p7, %p357_p6 }
  0x12   :  { %p360_p9 = pnand %p359_p8, %p353_p5 }
  0x14   :  { %363 = shalt.err (!%p360_p9)
}
  0x15   :  { %s371_s1 = smov [#allocation6]  }
  0x16   :  { %30 = dma.vmem_to_smem %s28_s13, 16, %s371_s1, [#allocation5]  }
  0x17   :  { %364 = dma.done.wait [#allocation4], 1024  }
  0x18   :  { %365 = vsyncadd [#allocation4], 4294966272 }
  0x19   :  { %366 = dma.done.wait [#allocation5], 16  }
  0x1a   :  { %367 = vsyncadd [#allocation5], 4294967280 }
  0x1b   :  { %37 = sfence }
  0x1c   :  { %v60_v0 = vld [vmem:[#allocation3 + $0x10] sm:$0xff]  ;;  %v58_v1 = vld [vmem:[#allocation3] sm:$0xff]  ;;  %vm47_vm0 = vcmask 556032   ;;  %s372_s20 = smov 2   ;;  %v61_v2 = vld [vmem:[#allocation3 + $0x18] sm:$0xff]  ;;  %v373_v4 = vmov 0.0   ;;  %v116_v11 = vlaneseq }
  0x1d   :  { %78 = vrot.lane.b32.xlu1 %v60_v0, %s372_s20  ;;  %74 = vrot.lane.b32.xlu0 %v58_v1, %s372_s20  ;;  %v59_v3 = vld [vmem:[#allocation3 + $0x8] sm:$0xff]  ;;  %50 = vst.msk [vmem:[#allocation2 + $0x10] sm:$0xff] %vm47_vm0, %v373_v4  ;;  %51 = vst.msk [vmem:[#allocation2 + $0x18] sm:$0xff] %vm47_vm0, %v373_v4  ;;  %vm56_vm1 = vcmask 551936   ;;  %v62_v6 = vld [vmem:[#allocation3 + $0x20] sm:$0xff]  ;;  %s38_s0 = sld [smem:[#allocation6]] }
  0x1e   :  { %48 = vst.msk [vmem:[#allocation2] sm:$0xff] %vm47_vm0, %v373_v4  ;;  %49 = vst.msk [vmem:[#allocation2 + $0x8] sm:$0xff] %vm47_vm0, %v373_v4  ;;  %v63_v5 = vld [vmem:[#allocation3 + $0x28] sm:$0xff]  ;;  %v65_v7 = vld [vmem:[#allocation3 + $0x38] sm:$0xff]  ;;  %s300_s21 = sld [smem:[#allocation6 + $0x1]]  ;;  %vm98_vm2 = vcmask 539664  }
  0x1f   :  { %52 = vst.msk [vmem:[#allocation2 + $0x20] sm:$0xff] %vm47_vm0, %v373_v4  ;;  %53 = vst.msk [vmem:[#allocation2 + $0x28] sm:$0xff] %vm47_vm0, %v373_v4  ;;  %v64_v8 = vld [vmem:[#allocation3 + $0x30] sm:$0xff]  ;;  %s301_s22 = sld [smem:[#allocation6 + $0x2]]  ;;  %v117_v14 = vshrl.u32 %v116_v11, 7  ;;  %v416_v18 = vand.u32 127, %v116_v11 }
  0x20   :  { %54 = vst.msk [vmem:[#allocation2 + $0x30] sm:$0xff] %vm47_vm0, %v373_v4  ;;  %55 = vst.msk [vmem:[#allocation2 + $0x38] sm:$0xff] %vm47_vm0, %v373_v4  ;;  %s302_s23 = sld [smem:[#allocation6 + $0x3]] }
  0x21   :  { %57 = vst.msk [vmem:[#allocation2 + $0x40] sm:$0xf] %vm56_vm1, %v373_v4  ;;  %80 = vrot.lane.b32.xlu1 %v61_v2, %s372_s20  ;;  %76 = vrot.lane.b32.xlu0 %v59_v3, %s372_s20  ;;  %s303_s24 = sld [smem:[#allocation6 + $0x4]]  ;;  %v125_v19 = vadd.s32 64, %v117_v14  ;;  %vm128_vm3 = vcmp.ge.s32.totalorder %v117_v14, 1  ;;  %vm155_vm4 = vcmp.ge.s32.totalorder %v416_v18, 1 }
  0x22   :  { %s304_s25 = sld [smem:[#allocation6 + $0x5]]  ;;  %vm165_vm6 = vcmp.le.s32.totalorder %v416_v18, 66  ;;  %vm452_vm7 = vmand %vm128_vm3, %vm155_vm4 }
  0x23   :  { %s305_s26 = sld [smem:[#allocation6 + $0x6]]  ;;  %v410_v15 = vstv %s38_s0  ;;  %vm145_vm5 = vcmp.le.s32.totalorder %v125_v19, 66  ;;  %vm476_vm8 = vmand %vm452_vm7, %vm165_vm6 }
  0x24   :  { %s306_s27 = sld [smem:[#allocation6 + $0x7]]  ;;  %v412_v16 = vstv %s300_s21  ;;  %vm488_vm9 = vmand %vm155_vm4, %vm165_vm6 }
  0x25   :  { %84 = vrot.lane.b32.xlu1 %v63_v5, %s372_s20  ;;  %82 = vrot.lane.b32.xlu0 %v62_v6, %s372_s20  ;;  %s406_s28 = sld [smem:[#allocation6 + $0x8]]  ;;  %v414_v17 = vstv %s301_s22  ;;  %vm164_vm10 = vmand %vm145_vm5, %vm155_vm4 }
  0x26   :  { %v418_v20 = vstv %s302_s23  ;;  %vm531_vm11 = vmand %vm164_vm10, %vm165_vm6 }
  0x27   :  { %v420_v21 = vstv %s303_s24 }
  0x28   :  { %v422_v25 = vstv %s304_s25 }
  0x29   :  { %88 = vrot.lane.b32.xlu1 %v65_v7, %s372_s20  ;;  %86 = vrot.lane.b32.xlu0 %v64_v8, %s372_s20  ;;  %v431_v29 = vstv %s305_s26 }
  0x2a   :  { %v433_v30 = vstv %s306_s27 }
  0x2b   :  { %v443_v38 = vstv %s406_s28 }
  0x8f   :  { %v79_v9 = vpop.permute.xlu1 %78  ;;  %v75_v10 = vpop.permute.xlu0 %74 }
  0x90   :  { %101 = vst.msk [vmem:[#allocation2 + $0x12] sm:$0xff] %vm98_vm2, %v79_v9  ;;  %99 = vst.msk [vmem:[#allocation2 + $0x2] sm:$0xff] %vm98_vm2, %v75_v10 }
  0x93   :  { %v81_v12 = vpop.permute.xlu1 %80  ;;  %v77_v13 = vpop.permute.xlu0 %76 }
  0x94   :  { %102 = vst.msk [vmem:[#allocation2 + $0x1a] sm:$0xff] %vm98_vm2, %v81_v12  ;;  %100 = vst.msk [vmem:[#allocation2 + $0xa] sm:$0xff] %vm98_vm2, %v77_v13 }
  0x97   :  { %v85_v22 = vpop.permute.xlu1 %84  ;;  %v83_v23 = vpop.permute.xlu0 %82  ;;  %v107_v24 = vld [vmem:[#allocation2] sm:$0xff] }
  0x98   :  { %104 = vst.msk [vmem:[#allocation2 + $0x2a] sm:$0xff] %vm98_vm2, %v85_v22  ;;  %103 = vst.msk [vmem:[#allocation2 + $0x22] sm:$0xff] %vm98_vm2, %v83_v23  ;;  %v176_v26 = vmul.f32 %v410_v15, %v107_v24  ;;  %v215_v27 = vmul.f32 %v412_v16, %v107_v24  ;;  %v255_v28 = vmul.f32 %v414_v17, %v107_v24 }
  0x9a   :  { %v186_v35 = vadd.f32 %v418_v20, %v176_v26  ;;  %v437_v36 = vadd.f32 %v420_v21, %v215_v27  ;;  %v440_v37 = vadd.f32 %v422_v25, %v255_v28 }
  0x9b   :  { %v110_v31 = vld [vmem:[#allocation2 + $0x18] sm:$0xff]  ;;  %v108_v32 = vld [vmem:[#allocation2 + $0x8] sm:$0xff]  ;;  %v109_v33 = vld [vmem:[#allocation2 + $0x10] sm:$0xff]  ;;  %v89_v34 = vpop.permute.xlu1 %88  ;;  %v87_v39 = vpop.permute.xlu0 %86 }
  0x9c   :  { %v179_v40 = vmul.f32 %v410_v15, %v110_v31  ;;  %v218_v41 = vmul.f32 %v412_v16, %v110_v31  ;;  %v258_v42 = vmul.f32 %v414_v17, %v110_v31  ;;  %v177_v43 = vmul.f32 %v410_v15, %v108_v32  ;;  %106 = vst.msk [vmem:[#allocation2 + $0x3a] sm:$0xff] %vm98_vm2, %v89_v34 }
  0x9d   :  { %105 = vst.msk [vmem:[#allocation2 + $0x32] sm:$0xff] %vm98_vm2, %v87_v39  ;;  %v178_v45 = vmul.f32 %v410_v15, %v109_v33  ;;  %v216_v46 = vmul.f32 %v412_v16, %v108_v32  ;;  %v217_v47 = vmul.f32 %v412_v16, %v109_v33  ;;  %v256_v48 = vmul.f32 %v414_v17, %v108_v32 }
  0x9e   :  { %v189_v49 = vadd.f32 %v418_v20, %v179_v40  ;;  %v228_v50 = vadd.f32 %v420_v21, %v218_v41  ;;  %v465_v51 = vadd.f32 %v422_v25, %v258_v42  ;;  %v187_v52 = vadd.f32 %v418_v20, %v177_v43 }
  0x9f   :  { %v188_v53 = vadd.f32 %v418_v20, %v178_v45  ;;  %v226_v54 = vadd.f32 %v420_v21, %v216_v46  ;;  %v227_v55 = vadd.f32 %v420_v21, %v217_v47  ;;  %v257_v56 = vmul.f32 %v414_v17, %v109_v33  ;;  %v111_v57 = vld [vmem:[#allocation2 + $0x20] sm:$0xff]  ;;  %v112_v58 = vld [vmem:[#allocation2 + $0x28] sm:$0xff] }
  0xa0   :  { %v266_v60 = vadd.f32 %v422_v25, %v256_v48  ;;  %v180_v61 = vmul.f32 %v410_v15, %v111_v57  ;;  %v181_v62 = vmul.f32 %v410_v15, %v112_v58  ;;  %v219_v63 = vmul.f32 %v412_v16, %v111_v57 }
  0xa1   :  { %v267_v1 = vadd.f32 %v422_v25, %v257_v56  ;;  %v220_v2 = vmul.f32 %v412_v16, %v112_v58  ;;  %v259_v3 = vmul.f32 %v414_v17, %v111_v57  ;;  %v260_v4 = vmul.f32 %v414_v17, %v112_v58 }
  0xa2   :  { %v190_v5 = vadd.f32 %v418_v20, %v180_v61  ;;  %v191_v6 = vadd.f32 %v418_v20, %v181_v62  ;;  %v229_v7 = vadd.f32 %v420_v21, %v219_v63  ;;  %v196_v8 = vsel %vm476_vm8, %v186_v35, %v431_v29 }
  0xa3   :  { %v230_v9 = vadd.f32 %v420_v21, %v220_v2  ;;  %v269_v10 = vadd.f32 %v422_v25, %v259_v3  ;;  %v270_v11 = vadd.f32 %v422_v25, %v260_v4  ;;  %v115_v12 = vld [vmem:[#allocation2 + $0x40] sm:$0xf]  ;;  %v197_v13 = vsel %vm488_vm9, %v187_v52, %v431_v29  ;;  %205 = vst.msk [vmem:[%s723_s2] sm:$0xff] %vm47_vm0, %v196_v8 }
  0xa4   :  { %v184_v14 = vmul.f32 %v410_v15, %v115_v12  ;;  %v198_v19 = vsel %vm488_vm9, %v188_v53, %v431_v29  ;;  %v199_v22 = vsel %vm488_vm9, %v189_v49, %v431_v29  ;;  %v200_v23 = vsel %vm488_vm9, %v190_v5, %v431_v29  ;;  %206 = vst.msk [vmem:[%s723_s2 + $0x8] sm:$0xff] %vm47_vm0, %v197_v13  ;;  %v113_v41 = vld [vmem:[#allocation2 + $0x30] sm:$0xff]  ;;  %v114_v42 = vld [vmem:[#allocation2 + $0x38] sm:$0xff] }
  0xa5   :  { %v201_v26 = vsel %vm488_vm9, %v191_v6, %v431_v29  ;;  %207 = vst.msk [vmem:[%s723_s2 + $0x10] sm:$0xff] %vm47_vm0, %v198_v19  ;;  %208 = vst.msk [vmem:[%s723_s2 + $0x18] sm:$0xff] %vm47_vm0, %v199_v22  ;;  %v223_v18 = vmul.f32 %v412_v16, %v115_v12  ;;  %v235_v27 = vsel %vm476_vm8, %v437_v36, %v433_v30 }
  0xa6   :  { %209 = vst.msk [vmem:[%s723_s2 + $0x20] sm:$0xff] %vm47_vm0, %v200_v23  ;;  %v236_v28 = vsel %vm488_vm9, %v226_v54, %v433_v30  ;;  %v194_v31 = vadd.f32 %v418_v20, %v184_v14  ;;  %210 = vst.msk [vmem:[%s723_s2 + $0x28] sm:$0xff] %vm47_vm0, %v201_v26  ;;  %v237_v32 = vsel %vm488_vm9, %v227_v55, %v433_v30 }
  0xa7   :  { %v238_v33 = vsel %vm488_vm9, %v228_v50, %v433_v30  ;;  %v239_v34 = vsel %vm488_vm9, %v229_v7, %v433_v30  ;;  %308 = vst.msk [vmem:[%s723_s2 + $0x48] sm:$0xff] %vm47_vm0, %v235_v27  ;;  %309 = vst.msk [vmem:[%s723_s2 + $0x50] sm:$0xff] %vm47_vm0, %v236_v28  ;;  %v233_v35 = vadd.f32 %v420_v21, %v223_v18 }
  0xa8   :  { %v240_v36 = vsel %vm488_vm9, %v230_v9, %v433_v30  ;;  %310 = vst.msk [vmem:[%s723_s2 + $0x58] sm:$0xff] %vm47_vm0, %v237_v32  ;;  %311 = vst.msk [vmem:[%s723_s2 + $0x60] sm:$0xff] %vm47_vm0, %v238_v33  ;;  %v263_v39 = vmul.f32 %v414_v17, %v115_v12  ;;  %v275_v40 = vsel %vm476_vm8, %v440_v37, %v443_v38 }
  0xa9   :  { %312 = vst.msk [vmem:[%s723_s2 + $0x68] sm:$0xff] %vm47_vm0, %v239_v34  ;;  %v204_v43 = vsel %vm531_vm11, %v194_v31, %v431_v29  ;;  %313 = vst.msk [vmem:[%s723_s2 + $0x70] sm:$0xff] %vm47_vm0, %v240_v36  ;;  %v276_v44 = vsel %vm488_vm9, %v266_v60, %v443_v38  ;;  %v277_v45 = vsel %vm488_vm9, %v267_v1, %v443_v38 }
  0xaa   :  { %v278_v37 = vsel %vm488_vm9, %v465_v51, %v443_v38  ;;  %317 = vst.msk [vmem:[%s723_s2 + $0x90] sm:$0xff] %vm47_vm0, %v275_v40  ;;  %v243_v46 = vsel %vm531_vm11, %v233_v35, %v433_v30  ;;  %v273_v47 = vadd.f32 %v422_v25, %v263_v39  ;;  %v279_v48 = vsel %vm488_vm9, %v269_v10, %v443_v38 }
  0xab   :  { %213 = vst.msk [vmem:[%s723_s2 + $0x40] sm:$0xf] %vm56_vm1, %v204_v43  ;;  %v280_v49 = vsel %vm488_vm9, %v270_v11, %v443_v38  ;;  %316 = vst.msk [vmem:[%s723_s2 + $0x88] sm:$0xf] %vm56_vm1, %v243_v46  ;;  %v182_v50 = vmul.f32 %v410_v15, %v113_v41  ;;  %v183_v51 = vmul.f32 %v410_v15, %v114_v42 }
  0xac   :  { %318 = vst.msk [vmem:[%s723_s2 + $0x98] sm:$0xff] %vm47_vm0, %v276_v44  ;;  %319 = vst.msk [vmem:[%s723_s2 + $0xa0] sm:$0xff] %vm47_vm0, %v277_v45  ;;  %v221_v52 = vmul.f32 %v412_v16, %v113_v41  ;;  %v222_v53 = vmul.f32 %v412_v16, %v114_v42  ;;  %v283_v54 = vsel %vm531_vm11, %v273_v47, %v443_v38 }
  0xad   :  { %320 = vst.msk [vmem:[%s723_s2 + $0xa8] sm:$0xff] %vm47_vm0, %v278_v37  ;;  %321 = vst.msk [vmem:[%s723_s2 + $0xb0] sm:$0xff] %vm47_vm0, %v279_v48  ;;  %v261_v55 = vmul.f32 %v414_v17, %v113_v41  ;;  %v262_v56 = vmul.f32 %v414_v17, %v114_v42  ;;  %v192_v57 = vadd.f32 %v418_v20, %v182_v50 }
  0xae   :  { %322 = vst.msk [vmem:[%s723_s2 + $0xb8] sm:$0xff] %vm47_vm0, %v280_v49  ;;  %v193_v15 = vadd.f32 %v418_v20, %v183_v51  ;;  %v231_v58 = vadd.f32 %v420_v21, %v221_v52  ;;  %v232_v16 = vadd.f32 %v420_v21, %v222_v53 }
  0xaf   :  { %325 = vst.msk [vmem:[%s723_s2 + $0xd0] sm:$0xf] %vm56_vm1, %v283_v54  ;;  %v271_v59 = vadd.f32 %v422_v25, %v261_v55  ;;  %v272_v60 = vadd.f32 %v422_v25, %v262_v56  ;;  %v202_v17 = vsel %vm488_vm9, %v192_v57, %v431_v29 }
  0xb0   :  { %v203_v61 = vsel %vm488_vm9, %v193_v15, %v431_v29  ;;  %v241_v20 = vsel %vm488_vm9, %v231_v58, %v433_v30  ;;  %v242_v21 = vsel %vm488_vm9, %v232_v16, %v433_v30  ;;  %211 = vst.msk [vmem:[%s723_s2 + $0x30] sm:$0xff] %vm47_vm0, %v202_v17 }
  0xb1   :  { %212 = vst.msk [vmem:[%s723_s2 + $0x38] sm:$0xff] %vm47_vm0, %v203_v61  ;;  %314 = vst.msk [vmem:[%s723_s2 + $0x78] sm:$0xff] %vm47_vm0, %v241_v20  ;;  %v281_v25 = vsel %vm488_vm9, %v271_v59, %v443_v38  ;;  %v282_v29 = vsel %vm488_vm9, %v272_v60, %v443_v38 }
  0xb2   :  { %315 = vst.msk [vmem:[%s723_s2 + $0x80] sm:$0xff] %vm47_vm0, %v242_v21  ;;  %323 = vst.msk [vmem:[%s723_s2 + $0xc0] sm:$0xff] %vm47_vm0, %v281_v25 }
  0xb3   :  { %324 = vst.msk [vmem:[%s723_s2 + $0xc8] sm:$0xff] %vm47_vm0, %v282_v29 }
  0xb4   :  { %298 = vsyncpa [#allocation4], 1 }
  0xb5   :  { %299 = vsyncpa [#allocation5], 1 }

</bundles_post_ra>
